<compile_context>
chip_gen: v5e
topology: v5e:2x2
jax: 0.10.0
libtpu: 0.0.40
codegen_flags: <defaults>
</compile_context>

<pallas_src>
import functools

import jax
import jax.numpy as jnp
from jax import lax
from jax.experimental import pallas as pl
from jax.experimental.pallas import tpu as pltpu

NUM_TASKS = 3   # stand-in for pargs.num_tasks
EPS = 1e-5
MOMENTUM = 0.1  # nn.BatchNorm1d default


def _bn1d_kernel(x_ref, y_ref, mean_ref, var_ref, *, bf16_normalize):
    """Non-affine batch-norm for one channel tile.

    x_ref / y_ref: (N, TC, L) -- full (N, L) reduction extent for TC channels.
    mean_ref / var_ref: (TC, 1) batch mean and biased variance (fp32).

    Streaming 3-pass reduction over N keeps the fp32 working set at O(TC*L).
    """
    n, tc, l = x_ref.shape
    inv_count = 1.0 / (n * l)
    unroll = True if n <= 8 else 4

    # Pass 1: per-channel sum (reduce L per slab on the XLU, accumulate over N).
    def sum_body(i, acc):
        xi = x_ref[i].astype(jnp.float32)                       # (TC, L)
        return acc + jnp.sum(xi, axis=-1, keepdims=True)
    total = lax.fori_loop(0, n, sum_body,
                          jnp.zeros((tc, 1), jnp.float32), unroll=unroll)
    mean = total * inv_count                                    # (TC, 1)

    # Pass 2: centered squared sum (numerically stable variance).
    def sq_body(i, acc):
        xc = x_ref[i].astype(jnp.float32) - mean                # (TC, L)
        return acc + jnp.sum(xc * xc, axis=-1, keepdims=True)
    sqsum = lax.fori_loop(0, n, sq_body,
                          jnp.zeros((tc, 1), jnp.float32), unroll=unroll)
    var = sqsum * inv_count
    inv_std = lax.rsqrt(var + EPS)                              # EUP, cheap

    mean_ref[...] = mean
    var_ref[...] = var

    # Pass 3: normalize and store, slab by slab (VMEM re-reads are cheap).
    if bf16_normalize:
        # bf16 VALU path (v6e/v7x): halves vreg footprint of the elementwise
        # pass; stats above were accumulated in fp32.
        mean_lo = mean.astype(y_ref.dtype)
        scale_lo = inv_std.astype(y_ref.dtype)

        def norm_body(i, carry):
            y_ref[i] = (x_ref[i] - mean_lo) * scale_lo
            return carry
    else:
        def norm_body(i, carry):
            xi = x_ref[i].astype(jnp.float32)
            y_ref[i] = ((xi - mean) * inv_std).astype(y_ref.dtype)
            return carry
    lax.fori_loop(0, n, norm_body, 0, unroll=unroll)


def _sublane_multiple(dtype):
    return 16 if jnp.dtype(dtype) == jnp.dtype(jnp.bfloat16) else 8


def _vmem_capacity_bytes():
    """Per-core VMEM capacity; conservative fallback if the query fails."""
    try:
        info = pltpu.get_tpu_info()
        cap = getattr(info, "vmem_capacity_bytes", None)
        if cap:
            return int(cap)
    except Exception:
        pass
    return 64 * 1024 * 1024  # v7x-safe default


def _vmem_budget_and_limit(cap_bytes):
    # v5e/v6e (128 MiB): limit 64 MiB, budget 48 MiB.
    # v7x (64 MiB per TC): limit 32 MiB (scoped default), budget 24 MiB.
    limit = max(16 * 1024 * 1024, min(cap_bytes // 2, 64 * 1024 * 1024))
    budget = (limit * 3) // 4
    return budget, limit


def _choose_channel_tile(n, c, l, dtype, budget_bytes):
    """Channel tile: fits VMEM budget, >=4 grid steps, even count when possible."""
    sub = _sublane_multiple(dtype)
    if c <= sub:
        return c                                   # full-C block (full-dim rule)
    itemsize = jnp.dtype(dtype).itemsize
    # Per-channel VMEM of one grid step: in + out tile, each double-buffered by
    # the automatic pipeline, plus the kernel's per-slab fp32 working set
    # (O(L) per channel thanks to the streaming reduction).
    bytes_per_channel = 4 * n * l * itemsize + 8 * l
    max_tc_vmem = max(sub, int(budget_bytes // bytes_per_channel) // sub * sub)
    # TODO(synk): if even a single-sublane-group block (sub, N, L) exceeds the
    # budget (very long N*L), add an 'arbitrary' grid axis over (N, L) with
    # (TC, 1) scratch accumulators (pl.when init/finalize) instead of shrinking
    # the channel tile below the sublane multiple.

    c_pad = pl.cdiv(c, sub) * sub
    steps = pl.cdiv(c_pad, max_tc_vmem)            # steps forced by VMEM
    min_steps = 4                                  # pipelining + 2 TCs on v7x
    if steps < min_steps and c > min_steps * sub:
        steps = min_steps
    if steps % 2 == 1 and c > (steps + 1) * sub:   # even split across 2 TCs
        steps += 1
    tc = pl.cdiv(pl.cdiv(c, steps), sub) * sub
    tc = min(tc, max_tc_vmem, c_pad)
    tc = max(tc, sub)
    if tc >= c:
        return c                                   # single full-C block
    return int(tc)


@functools.partial(
    jax.jit, static_argnames=("c_tile", "vmem_limit", "bf16_normalize"))
def _batchnorm1d_nonaffine(x, *, c_tile, vmem_limit, bf16_normalize):
    """x: (N, C, L) -> (y (N, C, L), batch mean (C,), biased batch var (C,))."""
    n, c, l = x.shape
    itemsize = jnp.dtype(x.dtype).itemsize
    kernel = functools.partial(_bn1d_kernel, bf16_normalize=bf16_normalize)
    y, mean, var = pl.pallas_call(
        kernel,
        out_shape=(
            jax.ShapeDtypeStruct((n, c, l), x.dtype),
            jax.ShapeDtypeStruct((c, 1), jnp.float32),
            jax.ShapeDtypeStruct((c, 1), jnp.float32),
        ),
        grid=(pl.cdiv(c, c_tile),),
        in_specs=[pl.BlockSpec((n, c_tile, l), lambda i: (0, i, 0))],
        out_specs=(
            pl.BlockSpec((n, c_tile, l), lambda i: (0, i, 0)),
            pl.BlockSpec((c_tile, 1), lambda i: (i, 0)),
            pl.BlockSpec((c_tile, 1), lambda i: (i, 0)),
        ),
        compiler_params=pltpu.CompilerParams(
            dimension_semantics=("parallel",),
            vmem_limit_bytes=int(vmem_limit),
        ),
        cost_estimate=pl.CostEstimate(
            flops=int(5 * n * c * l),
            transcendentals=int(c),
            bytes_accessed=int(2 * n * c * l * itemsize + 8 * c),
        ),
    )(x)
    return y, mean[:, 0], var[:, 0]


class MultitaskNonAffineBN1D:
    """JAX/Pallas port of the PyTorch module (training-mode forward)."""

    def __init__(self, dim, num_tasks=NUM_TASKS, momentum=MOMENTUM):
        self.dim = dim
        self.num_tasks = num_tasks
        self.momentum = momentum
        # Per-task running statistics, initialized like nn.BatchNorm1d.
        self.running_mean = jnp.zeros((num_tasks, dim), jnp.float32)
        self.running_var = jnp.ones((num_tasks, dim), jnp.float32)
        self.num_batches_tracked = [0] * num_tasks
        self.task = 0
        self.training = True
        self._vmem_budget, self._vmem_limit = _vmem_budget_and_limit(
            _vmem_capacity_bytes())
        # TODO(synk): eval-mode forward (normalize with the selected task's
        # running stats) is not implemented; the spec's forward is training mode.
        # TODO(synk): for L < 128 a one-time lane-dense relayout (e.g. (C, N*L))
        # upstream would avoid masked vst stores; not done here to keep the
        # kernel transpose-free on the module's native (N, C, L) layout.

    def __call__(self, x):
        n, c, l = x.shape
        assert c == self.dim
        c_tile = _choose_channel_tile(n, c, l, x.dtype, self._vmem_budget)
        bf16_normalize = jnp.dtype(x.dtype) == jnp.dtype(jnp.bfloat16)
        y, batch_mean, batch_var = _batchnorm1d_nonaffine(
            x, c_tile=c_tile, vmem_limit=self._vmem_limit,
            bf16_normalize=bool(bf16_normalize))
        if self.training:
            # EMA update of the selected task's buffers, matching PyTorch
            # (momentum = 0.1, running_var uses the *unbiased* batch variance;
            # m == 1 degenerate case returns the biased value instead of inf).
            m = n * l
            unbiased_var = batch_var * (m / max(m - 1, 1))
            t, mom = self.task, self.momentum
            self.running_mean = self.running_mean.at[t].set(
                (1.0 - mom) * self.running_mean[t] + mom * batch_mean)
            self.running_var = self.running_var.at[t].set(
                (1.0 - mom) * self.running_var[t] + mom * unbiased_var)
            self.num_batches_tracked[t] += 1
        return y


def _reference(x):
    """Pure-JAX reference of training-mode BatchNorm1d(affine=False)."""
    xf = x.astype(jnp.float32)
    mean = jnp.mean(xf, axis=(0, 2), keepdims=True)
    var = jnp.mean(jnp.square(xf - mean), axis=(0, 2), keepdims=True)
    return ((xf - mean) / jnp.sqrt(var + EPS)).astype(x.dtype)


if __name__ == "__main__":
    key = jax.random.PRNGKey(0)

    # Primary small shape, consistent with the module's (N, C, L) input.
    N, C, L = 2, 4, 16
    # Offset + scale stress the centered-variance path.
    x = jax.random.normal(key, (N, C, L), dtype=jnp.float32) * 3.0 + 5.0

    bn = MultitaskNonAffineBN1D(dim=C)
    bn.task = 0
    y = jax.block_until_ready(bn(x))

    y_ref = _reference(x)
    assert y.shape == x.shape and y.dtype == x.dtype
    assert jnp.allclose(y, y_ref, atol=1e-5, rtol=1e-5)

    # Running-stat EMA matches PyTorch's update rule.
    mean_ref = jnp.mean(x, axis=(0, 2))
    var_ref_unbiased = jnp.var(x, axis=(0, 2), ddof=1)
    assert jnp.allclose(bn.running_mean[0], MOMENTUM * mean_ref,
                        atol=1e-5, rtol=1e-5)
    assert jnp.allclose(bn.running_var[0],
                        (1.0 - MOMENTUM) * 1.0 + MOMENTUM * var_ref_unbiased,
                        atol=1e-5, rtol=1e-5)

    # Multi-tile channel grid with lane-dense L (C=768 -> TC=192, grid=(4,)).
    x2 = jax.random.normal(jax.random.PRNGKey(1), (2, 768, 128),
                           dtype=jnp.float32)
    bn2 = MultitaskNonAffineBN1D(dim=768)
    y2 = jax.block_until_ready(bn2(x2))
    assert jnp.allclose(y2, _reference(x2), atol=1e-5, rtol=1e-5)

    # Partial last channel tile (C % TC != 0): padded channel rows are masked
    # on store and never mix with valid channels.
    x3 = jax.random.normal(jax.random.PRNGKey(2), (2, 200, 128),
                           dtype=jnp.float32) * 2.0 - 1.0
    bn3 = MultitaskNonAffineBN1D(dim=200)
    y3 = jax.block_until_ready(bn3(x3))
    assert jnp.allclose(y3, _reference(x3), atol=1e-5, rtol=1e-5)

    print("KERNEL_OK")
</pallas_src>

<mosaic_0001>
module attributes {stable_mosaic.version = 11 : i64} {
  func.func @_bn1d_kernel(%arg0: i32, %arg1: memref<2x4x16xf32, #tpu.memory_space<vmem>>, %arg2: memref<2x4x16xf32, #tpu.memory_space<vmem>>, %arg3: memref<4x1xf32, #tpu.memory_space<vmem>>, %arg4: memref<4x1xf32, #tpu.memory_space<vmem>>) attributes {dimension_semantics = [#tpu.dimension_semantics<parallel>], iteration_bounds = array<i64: 1>, scalar_prefetch = 0 : i64, scratch_operands = 0 : i64, tpu.core_type = #tpu.core_type<tc>, window_params = [{transform_indices = @transform_0, window_bounds = array<i64: 2, 4, 16>}, {transform_indices = @transform_1, window_bounds = array<i64: 2, 4, 16>}, {transform_indices = @transform_2, window_bounds = array<i64: 4, 1>}, {transform_indices = @transform_3, window_bounds = array<i64: 4, 1>}]} {
    %cst = arith.constant 0.000000e+00 : f32
    %0 = vector.broadcast %cst : f32 to vector<4x1xf32>
    %c0_i32 = arith.constant 0 : i32
    %1 = arith.index_cast %c0_i32 : i32 to index
    %c0 = arith.constant 0 : index
    %c0_0 = arith.constant 0 : index
    %2 = vector.load %arg1[%1, %c0, %c0_0] : memref<2x4x16xf32, #tpu.memory_space<vmem>>, vector<1x4x16xf32>
    %3 = vector.shape_cast %2 : vector<1x4x16xf32> to vector<4x16xf32>
    %cst_1 = arith.constant dense<0.000000e+00> : vector<4xf32>
    %4 = vector.multi_reduction <add>, %3, %cst_1 [1] : vector<4x16xf32> to vector<4xf32>
    %5 = vector.shape_cast %4 : vector<4xf32> to vector<4x1xf32>
    %6 = arith.addf %0, %5 : vector<4x1xf32>
    %c1_i32 = arith.constant 1 : i32
    %7 = arith.index_cast %c1_i32 : i32 to index
    %c0_2 = arith.constant 0 : index
    %c0_3 = arith.constant 0 : index
    %8 = vector.load %arg1[%7, %c0_2, %c0_3] : memref<2x4x16xf32, #tpu.memory_space<vmem>>, vector<1x4x16xf32>
    %9 = vector.shape_cast %8 : vector<1x4x16xf32> to vector<4x16xf32>
    %cst_4 = arith.constant dense<0.000000e+00> : vector<4xf32>
    %10 = vector.multi_reduction <add>, %9, %cst_4 [1] : vector<4x16xf32> to vector<4xf32>
    %11 = vector.shape_cast %10 : vector<4xf32> to vector<4x1xf32>
    %12 = arith.addf %6, %11 : vector<4x1xf32>
    %c2_i32 = arith.constant 2 : i32
    %cst_5 = arith.constant 3.125000e-02 : f32
    %13 = vector.broadcast %cst_5 : f32 to vector<4x1xf32>
    %14 = arith.mulf %12, %13 : vector<4x1xf32>
    %cst_6 = arith.constant 0.000000e+00 : f32
    %15 = vector.broadcast %cst_6 : f32 to vector<4x1xf32>
    %c0_i32_7 = arith.constant 0 : i32
    %16 = arith.index_cast %c0_i32_7 : i32 to index
    %c0_8 = arith.constant 0 : index
    %c0_9 = arith.constant 0 : index
    %17 = vector.load %arg1[%16, %c0_8, %c0_9] : memref<2x4x16xf32, #tpu.memory_space<vmem>>, vector<1x4x16xf32>
    %18 = vector.shape_cast %17 : vector<1x4x16xf32> to vector<4x16xf32>
    %19 = vector.broadcast %14 : vector<4x1xf32> to vector<4x16xf32>
    %20 = arith.subf %18, %19 : vector<4x16xf32>
    %21 = arith.mulf %20, %20 : vector<4x16xf32>
    %cst_10 = arith.constant dense<0.000000e+00> : vector<4xf32>
    %22 = vector.multi_reduction <add>, %21, %cst_10 [1] : vector<4x16xf32> to vector<4xf32>
    %23 = vector.shape_cast %22 : vector<4xf32> to vector<4x1xf32>
    %24 = arith.addf %15, %23 : vector<4x1xf32>
    %c1_i32_11 = arith.constant 1 : i32
    %25 = arith.index_cast %c1_i32_11 : i32 to index
    %c0_12 = arith.constant 0 : index
    %c0_13 = arith.constant 0 : index
    %26 = vector.load %arg1[%25, %c0_12, %c0_13] : memref<2x4x16xf32, #tpu.memory_space<vmem>>, vector<1x4x16xf32>
    %27 = vector.shape_cast %26 : vector<1x4x16xf32> to vector<4x16xf32>
    %28 = vector.broadcast %14 : vector<4x1xf32> to vector<4x16xf32>
    %29 = arith.subf %27, %28 : vector<4x16xf32>
    %30 = arith.mulf %29, %29 : vector<4x16xf32>
    %cst_14 = arith.constant dense<0.000000e+00> : vector<4xf32>
    %31 = vector.multi_reduction <add>, %30, %cst_14 [1] : vector<4x16xf32> to vector<4xf32>
    %32 = vector.shape_cast %31 : vector<4xf32> to vector<4x1xf32>
    %33 = arith.addf %24, %32 : vector<4x1xf32>
    %c2_i32_15 = arith.constant 2 : i32
    %cst_16 = arith.constant 3.125000e-02 : f32
    %34 = vector.broadcast %cst_16 : f32 to vector<4x1xf32>
    %35 = arith.mulf %33, %34 : vector<4x1xf32>
    %cst_17 = arith.constant 9.99999974E-6 : f32
    %36 = vector.broadcast %cst_17 : f32 to vector<4x1xf32>
    %37 = arith.addf %35, %36 : vector<4x1xf32>
    %38 = math.rsqrt %37 : vector<4x1xf32>
    %c0_18 = arith.constant 0 : index
    %c0_19 = arith.constant 0 : index
    %39 = vector.load %arg3[%c0_18, %c0_19] : memref<4x1xf32, #tpu.memory_space<vmem>>, vector<4x1xf32>
    tpu.vector_store %arg3[%c0_18, %c0_19], %14 {strides = array<i32>} : memref<4x1xf32, #tpu.memory_space<vmem>>, vector<4x1xf32>,
    %c0_20 = arith.constant 0 : index
    %c0_21 = arith.constant 0 : index
    %40 = vector.load %arg4[%c0_20, %c0_21] : memref<4x1xf32, #tpu.memory_space<vmem>>, vector<4x1xf32>
    tpu.vector_store %arg4[%c0_20, %c0_21], %35 {strides = array<i32>} : memref<4x1xf32, #tpu.memory_space<vmem>>, vector<4x1xf32>,
    %c0_i32_22 = arith.constant 0 : i32
    %41 = arith.index_cast %c0_i32_22 : i32 to index
    %c0_23 = arith.constant 0 : index
    %c0_24 = arith.constant 0 : index
    %42 = vector.load %arg1[%41, %c0_23, %c0_24] : memref<2x4x16xf32, #tpu.memory_space<vmem>>, vector<1x4x16xf32>
    %43 = vector.shape_cast %42 : vector<1x4x16xf32> to vector<4x16xf32>
    %44 = vector.broadcast %14 : vector<4x1xf32> to vector<4x16xf32>
    %45 = arith.subf %43, %44 : vector<4x16xf32>
    %46 = vector.broadcast %38 : vector<4x1xf32> to vector<4x16xf32>
    %47 = arith.mulf %45, %46 : vector<4x16xf32>
    %48 = arith.index_cast %c0_i32_22 : i32 to index
    %c0_25 = arith.constant 0 : index
    %c0_26 = arith.constant 0 : index
    %49 = vector.load %arg2[%48, %c0_25, %c0_26] : memref<2x4x16xf32, #tpu.memory_space<vmem>>, vector<1x4x16xf32>
    %50 = vector.shape_cast %49 : vector<1x4x16xf32> to vector<4x16xf32>
    %51 = vector.shape_cast %47 : vector<4x16xf32> to vector<1x4x16xf32>
    tpu.vector_store %arg2[%48, %c0_25, %c0_26], %51 {strides = array<i32>} : memref<2x4x16xf32, #tpu.memory_space<vmem>>, vector<1x4x16xf32>,
    %c1_i32_27 = arith.constant 1 : i32
    %52 = arith.index_cast %c1_i32_27 : i32 to index
    %c0_28 = arith.constant 0 : index
    %c0_29 = arith.constant 0 : index
    %53 = vector.load %arg1[%52, %c0_28, %c0_29] : memref<2x4x16xf32, #tpu.memory_space<vmem>>, vector<1x4x16xf32>
    %54 = vector.shape_cast %53 : vector<1x4x16xf32> to vector<4x16xf32>
    %55 = vector.broadcast %14 : vector<4x1xf32> to vector<4x16xf32>
    %56 = arith.subf %54, %55 : vector<4x16xf32>
    %57 = vector.broadcast %38 : vector<4x1xf32> to vector<4x16xf32>
    %58 = arith.mulf %56, %57 : vector<4x16xf32>
    %59 = arith.index_cast %c1_i32_27 : i32 to index
    %c0_30 = arith.constant 0 : index
    %c0_31 = arith.constant 0 : index
    %60 = vector.load %arg2[%59, %c0_30, %c0_31] : memref<2x4x16xf32, #tpu.memory_space<vmem>>, vector<1x4x16xf32>
    %61 = vector.shape_cast %60 : vector<1x4x16xf32> to vector<4x16xf32>
    %62 = vector.shape_cast %58 : vector<4x16xf32> to vector<1x4x16xf32>
    tpu.vector_store %arg2[%59, %c0_30, %c0_31], %62 {strides = array<i32>} : memref<2x4x16xf32, #tpu.memory_space<vmem>>, vector<1x4x16xf32>,
    %c2_i32_32 = arith.constant 2 : i32
    return
  }
  func.func @transform_0(%arg0: i32) -> (i32, i32, i32) {
    %c0_i32 = arith.constant 0 : i32
    %c0_i32_0 = arith.constant 0 : i32
    %c0_i32_1 = arith.constant 0 : i32
    return %c0_i32, %arg0, %c0_i32_0 : i32, i32, i32
  }
  func.func @transform_1(%arg0: i32) -> (i32, i32, i32) {
    %c0_i32 = arith.constant 0 : i32
    %c0_i32_0 = arith.constant 0 : i32
    %c0_i32_1 = arith.constant 0 : i32
    return %c0_i32, %arg0, %c0_i32_0 : i32, i32, i32
  }
  func.func @transform_2(%arg0: i32) -> (i32, i32) {
    %c0_i32 = arith.constant 0 : i32
    %c0_i32_0 = arith.constant 0 : i32
    return %arg0, %c0_i32 : i32, i32
  }
  func.func @transform_3(%arg0: i32) -> (i32, i32) {
    %c0_i32 = arith.constant 0 : i32
    %c0_i32_0 = arith.constant 0 : i32
    return %arg0, %c0_i32 : i32, i32
  }
}

</mosaic_0001>

<bundles_post_ra>
// kernel: _batchnorm1d_nonaffine.1
= control target key start
LH: loop header
LB: loop body
LE: loop exit
PB: predicated region body
PF: predicated region fallthrough
CT: control target
= control target key end

     0   :  { %9 = vsyncpa [#allocation3], 0  ;;  %s212_s0 = inlined_call_operand.hbm [shape: f32[2,4,16], index: 0, kind: input, shape index: {}]   ;;  %s213_s1 = inlined_call_operand.hbm [shape: f32[2,4,16], index: 1, kind: output, shape index: {0}]   ;;  %s214_s2 = inlined_call_operand.vmem [shape: f32[4,1], index: 2, kind: output, shape index: {1}]   ;;  %s215_s3 = inlined_call_operand.vmem [shape: f32[4,1], index: 3, kind: output, shape index: {2}]  }
   0x1   :  { %10 = vsyncpa [#allocation4], 0  ;;  %s15_s14 = sshll.u32 %s212_s0, 4  ;;  %s162_s15 = smov [#allocation2]   ;;  %s16_s14 = int_to_ptr.hbm [resolvable:$true] %s15_s14 }
   0x2   :  { %s17_s16 = sshll.u32 %s162_s15, 4  ;;  %s163_s17 = smov 64   ;;  %s18_s16 = int_to_ptr.vmem [resolvable:$true] %s17_s16 }
   0x3   :  { %s164_s18 = smov 4  }
   0x4   :  { %23 = dma.hbm_to_vmem [thread:$0]  %s16_s14, 128, %s18_s16, [#allocation3], %s163_s17, %s163_s17, %s164_s18  }
   0x5   :  { %158 = dma.done.wait [#allocation3], 128  }
   0x6   :  { %159 = vsyncadd [#allocation3], 4294967168  ;;  %vm29_vm0 = vcmask 125952   ;;  %v28_v0 = vld [vmem:[#allocation2] sm:$0xf]  ;;  %vm65_vm1 = vcmask 3072  }
   0x7   :  { %v30_v1 = vsel %vm29_vm0, %v28_v0, 0.0  ;;  %v35_v2 = vld [vmem:[#allocation2 + $0x4] sm:$0xf]  ;;  %v68_v24 = vld [vmem:[#allocation2] sm:$0xf] }
   0x8   :  { %31 = vadd.xlane.f32.xlu0 %v30_v1  ;;  %v36_v3 = vsel %vm29_vm0, %v35_v2, 0.0  ;;  %v72_v25 = vld [vmem:[#allocation2 + $0x4] sm:$0xf] }
  0x10   :  { %37 = vadd.xlane.f32.xlu0 %v36_v3 }
  0x7b   :  { %v32_v4 = vpop.xlane.xlu0 %31 }
  0x83   :  { %v38_v5 = vpop.xlane.xlu0 %37 }
  0x84   :  { %v39_v6 = vadd.f32 %v38_v5, %v32_v4 }
  0x86   :  { %v40_v7 = vmul.f32 0.03125, %v39_v6 }
  0x88   :  { %v41_v8 = vsub.f32 %v28_v0, %v40_v7  ;;  %66 = vst.msk [vmem:[%s214_s2] sm:$0xf] %vm65_vm1, %v40_v7  ;;  %v47_v11 = vsub.f32 %v35_v2, %v40_v7  ;;  %v69_v27 = vsub.f32 %v68_v24, %v40_v7  ;;  %v73_v28 = vsub.f32 %v72_v25, %v40_v7  ;;  %s165_s2 = smov [#allocation5]  }
  0x89   :  { %s81_s22 = sshll.u32 %s165_s2, 4  ;;  %s82_s22 = int_to_ptr.vmem [resolvable:$true] %s81_s22 }
  0x8a   :  { %v42_v9 = vmul.f32 %v41_v8, %v41_v8  ;;  %v48_v12 = vmul.f32 %v47_v11, %v47_v11 }
  0x8c   :  { %v43_v10 = vsel %vm29_vm0, %v42_v9, 0.0  ;;  %v49_v13 = vsel %vm29_vm0, %v48_v12, 0.0 }
  0x8d   :  { %44 = vadd.xlane.f32.xlu1 %v43_v10 }
  0x95   :  { %50 = vadd.xlane.f32.xlu1 %v49_v13 }
 0x100   :  { %v45_v14 = vpop.xlane.xlu1 %44 }
 0x108   :  { %v51_v15 = vpop.xlane.xlu1 %50 }
 0x109   :  { %v52_v16 = vadd.f32 %v51_v15, %v45_v14 }
 0x10b   :  { %v53_v17 = vmul.f32 0.03125, %v52_v16 }
 0x10d   :  { %v54_v18 = vadd.f32 1e-05, %v53_v17  ;;  %67 = vst.msk [vmem:[%s215_s3] sm:$0xf] %vm65_vm1, %v53_v17  ;;  %s83_s3 = sshll.u32 %s213_s1, 4  ;;  %s84_s3 = int_to_ptr.hbm [resolvable:$true] %s83_s3 }
 0x10f   :  { %108 = vrsqrt.f32 %v54_v18  ;;  %vm61_vm3 = vweird.f32 %v54_v18 }
 0x115   :  { %v109_v19 = vpop.eup %108 }
 0x116   :  { %v56_v20 = vmul.f32 %v109_v19, %v54_v18  ;;  %vm62_vm2 = vweird.f32 %v109_v19 }
 0x117   :  { %vm63_vm4 = vmor %vm61_vm3, %vm62_vm2 }
 0x118   :  { %v57_v21 = vmul.f32 %v109_v19, %v56_v20 }
 0x11a   :  { %v58_v22 = vmul.f32 0.5, %v57_v21 }
 0x11c   :  { %v59_v23 = vsub.f32 1.5, %v58_v22 }
 0x11e   :  { %v60_v26 = vmul.f32 %v109_v19, %v59_v23 }
 0x120   :  { %v64_v29 = vsel %vm63_vm4, %v109_v19, %v60_v26 }
 0x121   :  { %v70_v30 = vmul.f32 %v69_v27, %v64_v29  ;;  %v74_v31 = vmul.f32 %v73_v28, %v64_v29 }
 0x123   :  { %71 = vst.msk [vmem:[#allocation5] sm:$0xf] %vm29_vm0, %v70_v30 }
 0x124   :  { %76 = vst.msk [vmem:[#allocation5 + $0x4] sm:$0xf] %vm29_vm0, %v74_v31 }
 0x125   :  { %89 = dma.vmem_to_hbm [thread:$0]  %s82_s22, 128, %s84_s3, [#allocation4], %s163_s17, %s163_s17, %s164_s18  }
 0x126   :  { %160 = dma.done.wait [#allocation4], 128  }
 0x127   :  { %161 = vsyncadd [#allocation4], 4294967168 }
 0x128   :  { %102 = vsyncpa [#allocation3], 1 }
 0x129   :  { %103 = vsyncpa [#allocation4], 1 }

</bundles_post_ra>
